<compile_context>
chip_gen: v6e
topology: v6e:2x2x1
jax: 0.10.0
libtpu: 0.0.40
codegen_flags: <defaults>
</compile_context>

<pallas_src>
import jax
import jax.numpy as jnp
from jax.experimental import pallas as pl
from jax.experimental.pallas import tpu as pltpu


def _round_up(x, m):
    return ((x + m - 1) // m) * m


# ---------------------------------------------------------------------------
# Pallas kernel: tiled GEMM, bias folded into the (output-resident) accumulator
# ---------------------------------------------------------------------------
def _gemm_bias_kernel(p_ref, w_ref, b_ref, o_ref):
    k = pl.program_id(1)

    @pl.when(k == 0)
    def _():
        # The f32 output block is revisited across k (constant block index),
        # so it is the accumulator; fold the bias into its init.
        o_ref[...] = jnp.broadcast_to(b_ref[...], o_ref.shape)

    o_ref[...] += jnp.dot(p_ref[...], w_ref[...],
                          preferred_element_type=jnp.float32)


def _gemm_bias(patches, weight_kn, bias_n, *, compute_dtype=jnp.bfloat16):
    """patches: (M, K), weight_kn: (K, N), bias_n: (N,) -> (M, N) float32.

    bf16 operands (MXU-native) with f32 accumulation by default; pass
    compute_dtype=jnp.float32 for exact f32-Conv2d numerics.
    """
    M, K = patches.shape
    _, N = weight_kn.shape

    cdtype = jnp.dtype(compute_dtype) if compute_dtype is not None else patches.dtype
    itemsize = cdtype.itemsize

    # ---- padding / tile selection ----------------------------------------
    K_pad = _round_up(K, 128)            # lane-aligned K, no TK-induced waste
    N_pad = _round_up(N, 128)            # lane-dense, unmasked output stores

    TM = min(1024, _round_up(M, 8))
    M_pad = _round_up(M, TM)
    # Keep >= 2 M tiles when possible so the "parallel" axis shards across
    # both v7x TensorCores (and the pipeline has something to overlap).
    if M_pad // TM < 2 and TM >= 16:
        TM = _round_up(M_pad // 2, 8)
        M_pad = _round_up(M, TM)

    # Weight-resident path: if the full (K_pad, N_pad) weight and a (TM, K_pad)
    # patches tile both fit comfortably in VMEM, take TK = K_pad.  The weight
    # block index is then constant over the whole grid -> DMA'd exactly once.
    if (K_pad * N_pad * itemsize <= 8 * 1024 * 1024
            and TM * K_pad * itemsize <= 4 * 1024 * 1024):
        TK = K_pad
    else:
        TK = min(1024, K_pad)
        while K_pad % TK != 0:           # divisor of K_pad, multiple of 128
            TK -= 128

    m_tiles = M_pad // TM
    k_steps = K_pad // TK

    # ---- operand prep (bf16 fast path; f32 accumulation either way) ------
    if compute_dtype is not None:
        patches = patches.astype(cdtype)
        weight_kn = weight_kn.astype(cdtype)
    patches_p = jnp.pad(patches, ((0, M_pad - M), (0, K_pad - K)))
    weight_p = jnp.pad(weight_kn, ((0, K_pad - K), (0, N_pad - N)))
    bias_p = jnp.pad(bias_n.astype(jnp.float32).reshape(1, N),
                     ((0, 0), (0, N_pad - N)))

    vmem_bytes = (2 * TM * TK * itemsize          # patches (double-buffered)
                  + 2 * TK * N_pad * itemsize     # weight
                  + 2 * TM * N_pad * 4            # output (doubles as f32 acc)
                  + 2 * N_pad * 4)                # bias
    vmem_limit = int(min(max(2 * vmem_bytes, 32 * 1024 * 1024),
                         64 * 1024 * 1024))       # safe on v5e / v6e / v7x

    weight_reads = 1 if k_steps == 1 else m_tiles
    cost = pl.CostEstimate(
        flops=2 * M_pad * K_pad * N_pad,
        transcendentals=0,
        bytes_accessed=int(patches_p.size * itemsize
                           + weight_reads * weight_p.size * itemsize
                           + bias_p.size * 4
                           + M_pad * N_pad * 4),
    )

    out = pl.pallas_call(
        _gemm_bias_kernel,
        out_shape=jax.ShapeDtypeStruct((M_pad, N_pad), jnp.float32),
        grid=(m_tiles, k_steps),                  # reduction (K) axis last
        in_specs=[
            pl.BlockSpec((TM, TK), lambda i, k: (i, k)),      # patches
            pl.BlockSpec((TK, N_pad), lambda i, k: (k, 0)),   # weight (resident when k_steps==1)
            pl.BlockSpec((1, N_pad), lambda i, k: (0, 0)),    # bias
        ],
        out_specs=pl.BlockSpec((TM, N_pad), lambda i, k: (i, 0)),
        compiler_params=pltpu.CompilerParams(
            dimension_semantics=("parallel", "arbitrary"),
            vmem_limit_bytes=vmem_limit,
            # Let XLA fuse the im2col reshape/transpose/pad + dtype cast into
            # the Pallas input DMAs instead of materializing them in HBM.
            allow_input_fusion=[True, True, True]),
        cost_estimate=cost,
    )(patches_p, weight_p, bias_p)

    return out[:M, :N]


# ---------------------------------------------------------------------------
# conv_embedding forward: Conv2d(in_channels, out_channels, patch_size, stride,
#                                padding, bias=True)
# ---------------------------------------------------------------------------
def conv_embedding_forward(x, weight, bias, *, stride, padding,
                           compute_dtype=jnp.bfloat16, return_tokens=False):
    """x: [B,C,H,W] NCHW, weight: [OC,C,KH,KW], bias: [OC] -> [B,OC,OH,OW]."""
    B, C, H, W = x.shape
    OC, _, KH, KW = weight.shape

    Hp, Wp = H + 2 * padding, W + 2 * padding
    OH = (Hp - KH) // stride + 1
    OW = (Wp - KW) // stride + 1
    M = B * OH * OW
    K = C * KH * KW

    if (padding == 0 and stride == KH and stride == KW
            and H % KH == 0 and W % KW == 0):
        # Patch-embedding fast path: non-overlapping patches -> one fused
        # reshape+transpose (single HBM pass, fusible into the kernel DMA).
        patches = x.reshape(B, C, OH, KH, OW, KW)
        patches = jnp.transpose(patches, (0, 2, 4, 1, 3, 5))  # (B,OH,OW,C,KH,KW)
        patches = patches.reshape(M, K)
    else:
        # General conv path: XLA window extraction; feature dim comes out
        # ordered (C, KH, KW), matching the weight reshape below.
        patches = jax.lax.conv_general_dilated_patches(
            x, filter_shape=(KH, KW), window_strides=(stride, stride),
            padding=((padding, padding), (padding, padding)),
            dimension_numbers=("NCHW", "OIHW", "NCHW"))        # (B, C*KH*KW, OH, OW)
        patches = jnp.transpose(patches, (0, 2, 3, 1)).reshape(M, K)

    # Weight [OC, C, KH, KW] -> [K, OC] (same (C, KH, KW) K-ordering).
    w_kn = weight.reshape(OC, K).T

    out = _gemm_bias(patches, w_kn, bias, compute_dtype=compute_dtype)  # (M, OC)

    if return_tokens:
        # ViT-token consumers skip the NCHW transpose entirely.
        return out.reshape(B, OH * OW, OC)
    out = out.reshape(B, OH, OW, OC)
    return jnp.transpose(out, (0, 3, 1, 2))       # NCHW (nn.Conv2d semantics)


if __name__ == "__main__":
    # Small shapes implied by the module: patch embedding of a 16x16 image.
    B, C_IN, H, W = 2, 4, 16, 16
    C_OUT = 32
    PATCH, STRIDE, PADDING = 4, 4, 0

    key = jax.random.PRNGKey(0)
    kx, kw, kb = jax.random.split(key, 3)

    x = jax.random.normal(kx, (B, C_IN, H, W), dtype=jnp.float32)
    fan_in = C_IN * PATCH * PATCH
    bound = 1.0 / (fan_in ** 0.5)
    weight = jax.random.uniform(kw, (C_OUT, C_IN, PATCH, PATCH),
                                dtype=jnp.float32, minval=-bound, maxval=bound)
    bias = jax.random.uniform(kb, (C_OUT,), dtype=jnp.float32,
                              minval=-bound, maxval=bound)

    def ref_conv(a, w, b, s, p):
        return jax.lax.conv_general_dilated(
            a, w, window_strides=(s, s), padding=((p, p), (p, p)),
            dimension_numbers=("NCHW", "OIHW", "NCHW"),
        ) + b.reshape(1, -1, 1, 1)

    # Exact-f32 path (matches PyTorch Conv2d numerics).
    fwd_f32 = jax.jit(lambda a, w, b: conv_embedding_forward(
        a, w, b, stride=STRIDE, padding=PADDING, compute_dtype=jnp.float32))
    out_f32 = jax.block_until_ready(fwd_f32(x, weight, bias))
    ref = ref_conv(x, weight, bias, STRIDE, PADDING)
    assert out_f32.shape == (B, C_OUT, H // STRIDE, W // STRIDE)
    assert jnp.allclose(out_f32, ref, atol=1e-4, rtol=1e-4)

    # Default fast path: bf16 operands, f32 accumulation.
    fwd_bf16 = jax.jit(lambda a, w, b: conv_embedding_forward(
        a, w, b, stride=STRIDE, padding=PADDING))
    out_bf16 = jax.block_until_ready(fwd_bf16(x, weight, bias))
    assert jnp.allclose(out_bf16, ref, atol=1e-1, rtol=5e-2)

    # General (overlapping / padded) conv path, exact-f32.
    K2, S2, P2, OC2 = 3, 2, 1, 16
    w2 = jax.random.uniform(kw, (OC2, C_IN, K2, K2), dtype=jnp.float32,
                            minval=-0.2, maxval=0.2)
    b2 = jax.random.uniform(kb, (OC2,), dtype=jnp.float32,
                            minval=-0.2, maxval=0.2)
    fwd_gen = jax.jit(lambda a, w, b: conv_embedding_forward(
        a, w, b, stride=S2, padding=P2, compute_dtype=jnp.float32))
    out_gen = jax.block_until_ready(fwd_gen(x, w2, b2))
    ref2 = ref_conv(x, w2, b2, S2, P2)
    assert out_gen.shape == ref2.shape
    assert jnp.allclose(out_gen, ref2, atol=1e-4, rtol=1e-4)

    print("KERNEL_OK")
</pallas_src>

<mosaic_0001>
module attributes {stable_mosaic.version = 11 : i64} {
  func.func @_gemm_bias_kernel(%arg0: i32, %arg1: i32, %arg2: memref<16x128xf32, #tpu.memory_space<vmem>>, %arg3: memref<128x128xf32, #tpu.memory_space<vmem>>, %arg4: memref<1x128xf32, #tpu.memory_space<vmem>>, %arg5: memref<16x128xf32, #tpu.memory_space<vmem>>) attributes {dimension_semantics = [#tpu.dimension_semantics<parallel>, #tpu.dimension_semantics<arbitrary>], iteration_bounds = array<i64: 2, 1>, scalar_prefetch = 0 : i64, scratch_operands = 0 : i64, tpu.core_type = #tpu.core_type<tc>, window_params = [{transform_indices = @transform_0, window_bounds = array<i64: 16, 128>}, {transform_indices = @transform_1, window_bounds = array<i64: 128, 128>}, {pipeline_mode = #tpu.pipeline_mode<synchronous>, transform_indices = @transform_2, window_bounds = array<i64: 1, 128>}, {transform_indices = @transform_3, window_bounds = array<i64: 16, 128>}]} {
    %c0_i32 = arith.constant 0 : i32
    %0 = arith.cmpi eq, %arg1, %c0_i32 : i32
    %1 = arith.extui %0 : i1 to i32
    %c0_i32_0 = arith.constant 0 : i32
    %2 = arith.cmpi ne, %1, %c0_i32_0 : i32
    scf.if %2 {
      %c0_8 = arith.constant 0 : index
      %c0_9 = arith.constant 0 : index
      %9 = vector.load %arg4[%c0_8, %c0_9] : memref<1x128xf32, #tpu.memory_space<vmem>>, vector<1x128xf32>
      %10 = vector.shape_cast %9 : vector<1x128xf32> to vector<1x128xf32>
      %11 = vector.broadcast %10 : vector<1x128xf32> to vector<16x128xf32>
      %c0_10 = arith.constant 0 : index
      %c0_11 = arith.constant 0 : index
      %12 = vector.load %arg5[%c0_10, %c0_11] : memref<16x128xf32, #tpu.memory_space<vmem>>, vector<16x128xf32>
      tpu.vector_store %arg5[%c0_10, %c0_11], %11 {strides = array<i32>} : memref<16x128xf32, #tpu.memory_space<vmem>>, vector<16x128xf32>,
    } else {
    }
    %c0 = arith.constant 0 : index
    %c0_1 = arith.constant 0 : index
    %3 = vector.load %arg5[%c0, %c0_1] : memref<16x128xf32, #tpu.memory_space<vmem>>, vector<16x128xf32>
    %c0_2 = arith.constant 0 : index
    %c0_3 = arith.constant 0 : index
    %4 = vector.load %arg2[%c0_2, %c0_3] : memref<16x128xf32, #tpu.memory_space<vmem>>, vector<16x128xf32>
    %c0_4 = arith.constant 0 : index
    %c0_5 = arith.constant 0 : index
    %5 = vector.load %arg3[%c0_4, %c0_5] : memref<128x128xf32, #tpu.memory_space<vmem>>, vector<128x128xf32>
    %cst = arith.constant dense<0.000000e+00> : vector<16x128xf32>
    %6 = tpu.matmul %4, %5, %cst {dimension_numbers = #tpu.dot_dimension_numbers<[1], [0], [0], [1], [0, 0, 1, 1], [], []>} : vector<16x128xf32>, vector<128x128xf32>, vector<16x128xf32> -> vector<16x128xf32>
    %7 = arith.addf %3, %6 : vector<16x128xf32>
    %c0_6 = arith.constant 0 : index
    %c0_7 = arith.constant 0 : index
    %8 = vector.load %arg5[%c0_6, %c0_7] : memref<16x128xf32, #tpu.memory_space<vmem>>, vector<16x128xf32>
    tpu.vector_store %arg5[%c0_6, %c0_7], %7 {strides = array<i32>} : memref<16x128xf32, #tpu.memory_space<vmem>>, vector<16x128xf32>,
    return
  }
  func.func @transform_0(%arg0: i32, %arg1: i32) -> (i32, i32) {
    %c0_i32 = arith.constant 0 : i32
    return %arg0, %arg1 : i32, i32
  }
  func.func @transform_1(%arg0: i32, %arg1: i32) -> (i32, i32) {
    %c0_i32 = arith.constant 0 : i32
    %c0_i32_0 = arith.constant 0 : i32
    return %arg1, %c0_i32 : i32, i32
  }
  func.func @transform_2(%arg0: i32, %arg1: i32) -> (i32, i32) {
    %c0_i32 = arith.constant 0 : i32
    %c0_i32_0 = arith.constant 0 : i32
    %c0_i32_1 = arith.constant 0 : i32
    return %c0_i32, %c0_i32_0 : i32, i32
  }
  func.func @transform_3(%arg0: i32, %arg1: i32) -> (i32, i32) {
    %c0_i32 = arith.constant 0 : i32
    %c0_i32_0 = arith.constant 0 : i32
    return %arg0, %c0_i32 : i32, i32
  }
}

</mosaic_0001>

<bundles_post_ra>
// kernel: _lambda_.2
= control target key start
LH: loop header
LB: loop body
LE: loop exit
PB: predicated region body
PF: predicated region fallthrough
CT: control target
= control target key end

     0   :  { %s1140_s0 = inlined_call_operand.vmem [shape: f32[64,32], index: 0, kind: input, shape index: {}]   ;;  %s1141_s1 = inlined_call_operand.<no memory space> [shape: f32[], index: 1, kind: input, shape index: {}]   ;;  %s1142_s2 = inlined_call_operand.vmem [shape: f32[32,64], index: 2, kind: input, shape index: {}]   ;;  %s1143_s3 = inlined_call_operand.vmem [shape: f32[1,32], index: 3, kind: input, shape index: {}]   ;;  %s1144_s4 = inlined_call_operand.hbm [shape: f32[32,128], index: 4, kind: output, shape index: {}]  }
   0x1   :  { %v948_v0 = vstv %s1141_s1 }
   0x2   :  { %12 = vsyncpa [#allocation18], 0 }
   0x3   :  { %14 = vsyncpa [#allocation18 + $0x1], 0  ;;  %s950_s17 = smov 0   ;;  %s952_s18 = smov 0  }
   0x4   :  { %s954_s19 = smov 0   ;;  %s956_s20 = smov 0  }
   0x5   :  { %s958_s21 = smov 0   ;;  %s960_s22 = smov 0  }
   0x6 LB: > { %s705_s1 = sadd.s32 4294967295, %s915_s22   ;;  %s706_s23 = sadd.s32 4294967294, %s915_s22   ;;  %s915_s22 = sphi %s960_s22, %s20_s22   ;;  %s911_s21 = sphi %s958_s21, %s1151_s21   ;;  %s907_s20 = sphi %s956_s20, %s1150_s20   ;;  %s903_s19 = sphi %s954_s19, %s1149_s19   ;;  %s899_s18 = sphi %s952_s18, %s1148_s18   ;;  %s895_s17 = sphi %s950_s17, %s1147_s17  }
   0x7   : > { %s32_s24 = sadd.s32 1, %s911_s21  ;;  %s114_s25 = sadd.s32 1, %s903_s19 }
   0x8   : > { %p34_p0 = scmp.ge.s32.totalorder %s32_s24, 2  ;;  %p124_p1 = scmp.ne.s32.totalorder %s903_s19, %s899_s18 }
   0x9   : > { %p125_p2 = scmp.eq.s32.totalorder %s705_s1, 1  ;;  %p130_p3 = scmp.ne.s32.totalorder %s899_s18, %s895_s17 }
   0xa   : > { %s1153_s24 = smov (%p34_p0, %s32_s24), 0  ;;  %p131_p5 = scmp.eq.s32.totalorder %s706_s23, 1 }
   0xb   : > { %p990_p4 = por %p125_p2, %p124_p1  ;;  %s111_s27 = ssub.s32 %s911_s21, %s1153_s24 }
   0xc   : > { %p710_p6 = scmp.ge.s32.totalorder %s915_s22, 1  ;;  %p112_p7 = scmp.eq.s32.totalorder %s111_s27, 0 }
   0xd   : > { %p997_p8 = por %p131_p5, %p130_p3  ;;  %p181_p9 = scmp.lt.s32.totalorder %s915_s22, 3 }
   0xe   : > { %s1003_s29 = scalar_select %p112_p7, %s903_s19, %s114_s25  }
   0xf   : > { %p182_p10 = pnand %p710_p6, %p181_p9 }
  0x10   : > { %s214_s30 = sand.u32 (!%p182_p10), 1, %s899_s18   ;;  %s712_s5 = sshll.u32 (!%p182_p10), %s907_s20, 1 }
  0x11   : > { %185 = sbr.rel (%p182_p10) target bundleno = 273 (0x111), region = 32  ;;  %s711_s6 = sshll.u32 (!%p182_p10), %s214_s30, 4 }
  0x12   : > { %p220_p11 = scmp.lt.s32.totalorder (!%p182_p10), %s712_s5, 3 }
  0x16   : > { %v250_v1 = vlaneseq  ;;  %v282_v2 = vld [vmem:[%s1140_s0] sm:$0xff]  ;;  %v715_v3 = vld [vmem:[%s1140_s0 + $0x8] sm:$0xff]  ;;  %v716_v5 = vld [vmem:[%s1140_s0 + $0x10] sm:$0xff]  ;;  %s1155_s5 = smov (!%p220_p11, %s712_s5), 3 }
  0x17   : > { %v717_v6 = vld [vmem:[%s1140_s0 + $0x18] sm:$0xff]  ;;  %v718_v7 = vld [vmem:[%s1140_s0 + $0x20] sm:$0xff]  ;;  %v719_v8 = vld [vmem:[%s1140_s0 + $0x28] sm:$0xff]  ;;  %s713_s9 = sshll.u32 %s1155_s5, 3  ;;  %s1054_s5 = scalar_lea.vmem [#allocation17], %s711_s6 }
  0x18   : > { %v251_v4 = vand.u32 127, %v250_v1  ;;  %v720_v9 = vld [vmem:[%s1140_s0 + $0x30] sm:$0xff]  ;;  %v721_v10 = vld [vmem:[%s1140_s0 + $0x38] sm:$0xff]  ;;  %s226_s12 = scalar_lea.vmem %s1142_s2, %s713_s9 }
  0x19   : > { %v244_v19 = vld [vmem:[%s226_s12] sm:$0xff]  ;;  %v714_v20 = vld [vmem:[%s226_s12 + $0x8] sm:$0xff] }
  0x1a   : > { %vm254_vm0 = vcmp.lt.s32.totalorder %v251_v4, 64  ;;  %vm290_vm1 = vcmp.lt.s32.totalorder %v251_v4, 32 }
  0x1b   : > { %v291_v11 = vsel %vm290_vm1, %v282_v2, %v948_v0  ;;  %v310_v12 = vsel %vm290_vm1, %v715_v3, %v948_v0  ;;  %v330_v13 = vsel %vm290_vm1, %v716_v5, %v948_v0  ;;  %v350_v14 = vsel %vm290_vm1, %v717_v6, %v948_v0 }
  0x1c   : > { %v370_v15 = vsel %vm290_vm1, %v718_v7, %v948_v0  ;;  %v390_v16 = vsel %vm290_vm1, %v719_v8, %v948_v0  ;;  %v410_v17 = vsel %vm290_vm1, %v720_v9, %v948_v0  ;;  %v430_v18 = vsel %vm290_vm1, %v721_v10, %v948_v0 }
  0x1d   : > { %v255_v21 = vsel %vm254_vm0, %v244_v19, %v948_v0  ;;  %v274_v22 = vsel %vm254_vm0, %v714_v20, %v948_v0 }
  0x1e   : > { %v695_v23 = vld [vmem:[%s1143_s3] sm:$0x1]  ;;  %v697_v24 = vshrl.u32 %v250_v1, 7  ;;  %747 = vmatprep.subr.mxu0 %v948_v0  ;;  %779 = vmatprep.mubr.f32.mxu0 %v255_v21  ;;  %s728_s6 = sshll.u32 %s907_s20, 8  ;;  %s607_s15 = sshll.u32 %s1054_s5, 4  ;;  %s1089_s15 = int_to_ptr.vmem [resolvable:$true] %s607_s15 }
  0x1f   : > { %748 = vmatpush3.msra.mxu0 %v948_v0  ;;  %s1087_s23 = scalar_lea.hbm %s1144_s4, %s728_s6  ;;  %s1095_s20 = scalar_lea.sflag [#allocation18], %s214_s30 }
  0x20   : > { %vm698_vm2 = vcmp.lt.s32.totalorder %v697_v24, 1  ;;  %749 = vmatprep.subr.mxu0 %v948_v0  ;;  %s839_s25 = scalar_lea.vmem %s1089_s15, 256  ;;  %s917_s27 = smov [#allocation17]  }
  0x21   : > { %v699_v25 = vsel %vm698_vm2, %v695_v23, %v948_v0  ;;  %750 = vmatpush3.msra.mxu0 %v948_v0  ;;  %p840_p12 = scmp.ne.s32.totalorder %s1089_s15, %s839_s25  ;;  %s843_s7 = sshll.u32 %s917_s27, 4  ;;  %s844_s7 = int_to_ptr.vmem [resolvable:$false] %s843_s7 }
  0x22   : > { %v703_v26 = vsel %vm290_vm1, %v699_v25, %v948_v0  ;;  %751 = vmatprep.subr.mxu0 %v948_v0  ;;  %s845_s8 = scalar_lea.vmem %s844_s7, 512  ;;  %p846_p1 = scmp.lt.s32.totalorder %s1089_s15, %s844_s7 }
  0x23   : > { %704 = vst [vmem:[#allocation22] sm:$0x1] %v703_v26  ;;  %752 = vmatpush3.msra.mxu0 %v948_v0  ;;  %p841_p13 = pnand %p840_p12, %p990_p4  ;;  %p847_p2 = scmp.lt.s32.totalorder %s845_s8, %s839_s25 }
  0x24   : > { %753 = vmatprep.subr.mxu0 %v948_v0 }
  0x25   : > { %754 = vmatpush3.msra.mxu0 %v948_v0  ;;  %p842_p0 = pneg %p841_p13  ;;  %p848_p3 = por %p847_p2, %p846_p1 }
  0x26   : > { %755 = vmatprep.subr.mxu0 %v948_v0 }
  0x27   : > { %756 = vmatpush3.msra.mxu0 %v948_v0  ;;  %p849_p5 = pnand %p848_p3, %p842_p0 }
  0x28   : > { %757 = vmatprep.subr.mxu0 %v948_v0 }
  0x29   : > { %758 = vmatpush3.msra.mxu0 %v948_v0 }
  0x2a   : > { %v722_v27 = vld [vmem:[#allocation22] ss:$0 sm:$0xff]  ;;  %759 = vmatprep.subr.mxu0 %v948_v0 }
  0x2b   : > { %492 = vst [vmem:[%s1054_s5] sm:$0xff] %v722_v27  ;;  %493 = vst [vmem:[%s1054_s5 + $0x8] sm:$0xff] %v722_v27  ;;  %760 = vmatpush3.msra.mxu0 %v948_v0 }
  0x2c   : > { %761 = vmatprep.subr.mxu0 %v948_v0 }
  0x2d   : > { %762 = vmatpush3.msra.mxu0 %v948_v0 }
  0x2e   : > { %763 = vmatprep.subr.mxu0 %v430_v18 }
  0x2f   : > { %764 = vmatpush3.msra.mxu0 %v430_v18 }
  0x30   : > { %765 = vmatprep.subr.mxu0 %v410_v17 }
  0x31   : > { %766 = vmatpush3.msra.mxu0 %v410_v17 }
  0x32   : > { %767 = vmatprep.subr.mxu0 %v390_v16  ;;  %v495_v28 = vld [vmem:[%s1054_s5 + $0x8] sm:$0xff]  ;;  %v494_v30 = vld [vmem:[%s1054_s5] sm:$0xff] }
  0x33   : > { %768 = vmatpush3.msra.mxu0 %v390_v16 }
  0x34   : > { %769 = vmatprep.subr.mxu0 %v370_v15 }
  0x35   : > { %770 = vmatpush3.msra.mxu0 %v370_v15 }
  0x36   : > { %771 = vmatprep.subr.mxu0 %v350_v14 }
  0x37   : > { %772 = vmatpush3.msra.mxu0 %v350_v14 }
  0x38   : > { %773 = vmatprep.subr.mxu0 %v330_v13 }
  0x39   : > { %774 = vmatpush3.msra.mxu0 %v330_v13 }
  0x3a   : > { %775 = vmatprep.subr.mxu0 %v310_v12 }
  0x3b   : > { %776 = vmatpush3.msra.mxu0 %v310_v12 }
  0x3c   : > { %777 = vmatprep.subr.mxu0 %v291_v11 }
  0x3d   : > { %778 = vmatpush3.msra.mxu0 %v291_v11 }
  0x3e   : > { %780 = vmatmul.mubr.f32.vlgmr.msra.gmra.mxu0 %v274_v22 }
  0xfe   : > { %v781_v29 = vpop.f32.mrf.mxu0 }
  0xff   : > { %v590_v31 = vadd.f32 %v781_v29, %v495_v28 }
 0x100   : > { %v580_v32 = vpop.f32.mrf.mxu0 }
 0x101   : > { %592 = vst [vmem:[%s1054_s5 + $0x8] sm:$0xff] %v590_v31  ;;  %v589_v33 = vadd.f32 %v580_v32, %v494_v30 }
 0x103   : > { %591 = vst [vmem:[%s1054_s5] sm:$0xff] %v589_v33 }
 0x104   : > { %852 = shalt.err (!%p849_p5)
}
 0x105   : > { %s853_s30 = scalar_lea.hbm %s1087_s23, 256  ;;  %s857_s11 = scalar_lea.hbm %s1144_s4, 512 }
 0x106   : > { %p854_p6 = scmp.ne.s32.totalorder %s1087_s23, %s853_s30  ;;  %p858_p10 = scmp.lt.s32.totalorder %s1087_s23, %s1144_s4 }
 0x107   : > { %p859_p11 = scmp.lt.s32.totalorder %s857_s11, %s853_s30 }
 0x108   : > { %p855_p7 = pnand %p854_p6, %p990_p4 }
 0x109   : > { %p860_p12 = por %p859_p11, %p858_p10 }
 0x10a   : > { %p856_p9 = pneg %p855_p7 }
 0x10c   : > { %p861_p13 = pnand %p860_p12, %p856_p9 }
 0x10e   : > { %864 = shalt.err (!%p861_p13)
}
 0x10f   : > { %s918_s13 = smov 128   ;;  %s919_s14 = smov 8  }
 0x110   : > { %782 = dma.vmem_to_hbm [thread:$0]  (%p990_p4), %s1089_s15, 256, %s1087_s23, %s1095_s20, %s918_s13, %s918_s13, %s919_s14  }
 0x111 PF: > { %p788_p0 = scmp.ge.s32.totalorder %s915_s22, 2  ;;  %s622_s6 = sand.u32 1, %s895_s17  }
 0x112   : > { %s623_s16 = scalar_lea.sflag [#allocation18], %s622_s6 }
 0x113   : > { %p785_p1 = pnand %p788_p0, %p997_p8 }
 0x115   : > { %p786_p2 = pneg %p785_p1 }
 0x117   : > { %890 = dma.done.wait (%p786_p2), %s623_s16, 256  }
 0x118   : > { %892 = vsyncadd (%p786_p2), %s623_s16, 4294967040  ;;  %s20_s22 = sadd.s32 1, %s915_s22   ;;  %s1147_s17 = smov %s899_s18 }
 0x119   : > { %p17_p3 = scmp.ge.s32.totalorder %s20_s22, 4   ;;  %s1148_s18 = smov %s903_s19 }
 0x11a   : > { %s1149_s19 = smov %s1003_s29  ;;  %s1150_s20 = smov %s911_s21 }
 0x11b   : > { %s1151_s21 = smov %s1153_s24  ;;  %19 = sbr.rel (!%p17_p3) target bundleno = 6 (0x6), region = 98 }
 0x120   :  { %628 = vsyncpa [#allocation18], 1 }
 0x121   :  { %630 = vsyncpa [#allocation18 + $0x1], 1 }

</bundles_post_ra>
